<compile_context>
chip_gen: v5e
topology: v5e:2x2
jax: 0.10.0
libtpu: 0.0.40
codegen_flags: <defaults>
</compile_context>

<pallas_src>
import functools

import jax
import jax.numpy as jnp
from jax import lax
from jax.experimental import pallas as pl
from jax.experimental.pallas import tpu as pltpu

_LANES = 128
_INT_MAX = jnp.iinfo(jnp.int32).max


# --------------------------------------------------------------------------- #
# Kernel
# --------------------------------------------------------------------------- #
def _retrieve_kernel(q_ref, e_ref, esq_ref, dist_ref, idx_ref,
                     lane_dist_ref, lane_idx_ref, *, tn, tiles_per_split):
    s = pl.program_id(0)              # partition (parallel axis)
    k = pl.program_id(1)              # index tile within partition (reduction axis)

    @pl.when(k == 0)
    def _init():
        lane_dist_ref[...] = jnp.full_like(lane_dist_ref, jnp.inf)
        lane_idx_ref[...] = jnp.zeros_like(lane_idx_ref)

    q = q_ref[...]                    # [B, D]  (native dtype; bf16 OK)
    e = e_ref[...]                    # [tn, D]
    B = q.shape[0]

    # -2 * <q, e> via direct contraction (no e.T materialization); exact pow2 scale.
    qm2 = q * jnp.asarray(-2.0, q.dtype)
    dots_m2 = lax.dot_general(qm2, e, (((1,), (1,)), ((), ())),
                              preferred_element_type=jnp.float32)     # [B, tn]

    # dist = -2<q,e> + ||e||^2 ; ||q||^2 is constant w.r.t. argmin, added at finalize.
    # esq_ref is [1, tn] f32; padded positions hold +inf so they can never win.
    dist = dots_m2 + esq_ref[...]                                     # [B, tn]

    base = (s * tiles_per_split + k) * tn
    lane_iota = lax.broadcasted_iota(jnp.int32, (B, _LANES), 1)
    g_idx0 = base + lane_iota                                         # hoisted broadcast

    # Per-lane running min kept in vregs; one VMEM load + one store per grid step.
    run_d = lane_dist_ref[...]                                        # [B, 128]
    run_i = lane_idx_ref[...]                                         # [B, 128]
    for c in range(tn // _LANES):
        chunk = dist[:, c * _LANES:(c + 1) * _LANES]                  # [B, 128]
        g_idx = g_idx0 + (c * _LANES)
        take = chunk < run_d
        run_i = jnp.where(take, g_idx, run_i)
        run_d = jnp.where(take, chunk, run_d)
    lane_dist_ref[...] = run_d
    lane_idx_ref[...] = run_i

    @pl.when(k == pl.num_programs(1) - 1)
    def _finalize():
        q_f32 = q.astype(jnp.float32)
        q_sq = jnp.sum(q_f32 * q_f32, axis=-1, keepdims=True)         # [B, 1]
        best = jnp.min(run_d, axis=-1, keepdims=True)                 # [B, 1]
        # Lowest global index among lanes tying the min (first-occurrence semantics).
        cand = jnp.where(run_d == best, run_i, _INT_MAX)
        best_idx = jnp.min(cand, axis=-1, keepdims=True)              # [B, 1]
        dist_ref[0] = jnp.maximum(best + q_sq, 0.0)                   # clamp cancellation
        idx_ref[0] = best_idx


# --------------------------------------------------------------------------- #
# Wrapper
# --------------------------------------------------------------------------- #
def _round_up(x, m):
    return ((x + m - 1) // m) * m


def _default_num_splits():
    # v7x has 2 TensorCores per chip (megacore): shard the leading parallel axis.
    # v5e/v6e have 1 TC, where a second split is pure overhead.
    try:
        info = pltpu.get_tpu_info()
        for attr in ("num_tensorcores", "tensorcore_count", "num_cores",
                     "cores_per_chip"):
            v = getattr(info, attr, None)
            if isinstance(v, int) and v >= 2:
                return 2
    except Exception:
        pass
    return 1


def _resolve_tn(tn, N, D, itemsize):
    if tn is None:
        tn = 2048                      # sweepable; good default for D ~ 128
    # Keep the double-buffered E tile within a budget safe on every generation
    # (v7x physical VMEM is only 64 MiB/TC).
    budget = 16 << 20
    cap = max(_LANES, (budget // (2 * D * itemsize)) // _LANES * _LANES)
    tn = min(tn, cap)
    tn = max(_LANES, min(_round_up(tn, _LANES), _round_up(max(N, 1), _LANES)))
    return tn


def build_index(index_embeddings: jax.Array, *, tn: int | None = None,
                num_splits: int | None = None):
    """One-time index preparation (pad E, precompute lane-major ||e||^2).

    Mirrors the persistent `self.index` of the original module: call once when
    the index changes, reuse the result for every retrieve().
    """
    N, D = index_embeddings.shape
    assert N > 0, "empty index"
    itemsize = jnp.dtype(index_embeddings.dtype).itemsize

    tn = _resolve_tn(tn, N, D, itemsize)
    if num_splits is None:
        num_splits = _default_num_splits()
    n_tiles = pl.cdiv(N, tn)
    num_splits = max(1, min(num_splits, n_tiles))
    tiles_per_split = pl.cdiv(n_tiles, num_splits)
    n_pad = num_splits * tiles_per_split * tn

    e = index_embeddings
    if n_pad != N:
        e = jnp.pad(e, ((0, n_pad - N), (0, 0)))                      # zero-pad rows

    e_f32 = index_embeddings.astype(jnp.float32)
    e_sq = jnp.sum(e_f32 * e_f32, axis=-1)                            # [N]
    if n_pad != N:
        # +inf on the padded tail: padded positions can never win the argmin.
        e_sq = jnp.concatenate(
            [e_sq, jnp.full((n_pad - N,), jnp.inf, jnp.float32)])
    e_sq = e_sq.reshape(1, n_pad)                                     # lane-major

    return {
        "e": e, "e_sq": e_sq, "n_valid": N,
        "tn": tn, "num_splits": num_splits, "tiles_per_split": tiles_per_split,
    }


@functools.partial(jax.jit, static_argnames=("tn", "num_splits", "tiles_per_split"))
def _retrieve_jit(queries, e, e_sq, *, tn, num_splits, tiles_per_split):
    B, D = queries.shape

    kernel = functools.partial(_retrieve_kernel, tn=tn,
                               tiles_per_split=tiles_per_split)

    # VMEM limit derived from the actual (double-buffered) block sizes + headroom.
    e_bytes = 2 * tn * D * jnp.dtype(e.dtype).itemsize
    esq_bytes = 2 * tn * 4
    q_bytes = 2 * B * D * jnp.dtype(queries.dtype).itemsize
    out_bytes = 2 * 2 * B * 4
    scratch_bytes = B * _LANES * (4 + 4)
    vmem_limit = int(1.5 * (e_bytes + esq_bytes + q_bytes + out_bytes
                            + scratch_bytes)) + (2 << 20)
    vmem_limit = min(max(vmem_limit, 4 << 20), 64 << 20)

    part_dist, part_idx = pl.pallas_call(
        kernel,
        out_shape=(
            jax.ShapeDtypeStruct((num_splits, B, 1), jnp.float32),
            jax.ShapeDtypeStruct((num_splits, B, 1), jnp.int32),
        ),
        grid_spec=pltpu.PrefetchScalarGridSpec(
            num_scalar_prefetch=0,
            grid=(num_splits, tiles_per_split),
            in_specs=[
                pl.BlockSpec((B, D), lambda s, k: (0, 0)),            # queries resident
                pl.BlockSpec((tn, D),                                  # streamed E tile
                             lambda s, k: (s * tiles_per_split + k, 0)),
                pl.BlockSpec((1, tn),                                  # streamed ||e||^2
                             lambda s, k: (0, s * tiles_per_split + k)),
            ],
            out_specs=[
                pl.BlockSpec((1, B, 1), lambda s, k: (s, 0, 0)),
                pl.BlockSpec((1, B, 1), lambda s, k: (s, 0, 0)),
            ],
            scratch_shapes=[
                pltpu.VMEM((B, _LANES), jnp.float32),   # per-lane running min dist
                pltpu.VMEM((B, _LANES), jnp.int32),     # per-lane running argmin
            ],
        ),
        compiler_params=pltpu.CompilerParams(
            dimension_semantics=("parallel", "arbitrary"),
            vmem_limit_bytes=vmem_limit,
        ),
    )(queries, e, e_sq)

    # Combine per-partition winners; ties resolve to the lowest global index.
    best_dist = jnp.min(part_dist, axis=0)                            # [B, 1]
    cand = jnp.where(part_dist == best_dist[None], part_idx, _INT_MAX)
    best_idx = jnp.min(cand, axis=0)                                  # [B, 1]
    return best_dist, best_idx


def retrieve(queries: jax.Array, index: dict):
    """Nearest-frame retrieval against a prebuilt index (see build_index)."""
    return _retrieve_jit(queries, index["e"], index["e_sq"],
                         tn=index["tn"], num_splits=index["num_splits"],
                         tiles_per_split=index["tiles_per_split"])


if __name__ == "__main__":
    # Deterministic synthetic "indexed" embeddings and request embeddings.
    # (The original module populates self.index via an embedding model; here we
    #  initialize equivalent tensors in-script.)
    key = jax.random.PRNGKey(0)
    k_q, k_e = jax.random.split(key)

    B, D, N = 8, 128, 1000         # requests, embedding dim, indexed noun frames
    queries = jax.random.normal(k_q, (B, D), dtype=jnp.float32)
    index_embeddings = jax.random.normal(k_e, (N, D), dtype=jnp.float32)

    # Small tn / 2 splits to exercise the multi-tile reduction, the parallel
    # split combine, and the +inf-padded tail handling.
    index = build_index(index_embeddings, tn=256, num_splits=2)
    best_dist, best_idx = retrieve(queries, index)
    jax.block_until_ready((best_dist, best_idx))

    # Pure-JAX reference.
    q = queries.astype(jnp.float32)
    e = index_embeddings.astype(jnp.float32)
    full = (jnp.sum(q * q, axis=-1, keepdims=True)
            - 2.0 * q @ e.T
            + jnp.sum(e * e, axis=-1)[None, :])                       # [B, N]
    ref_dist = jnp.min(full, axis=-1, keepdims=True)

    assert best_dist.shape == (B, 1) and best_idx.shape == (B, 1)
    assert jnp.allclose(best_dist, ref_dist, rtol=1e-3, atol=1e-3)
    # Index check robust to FP near-ties: the distance at the returned index must
    # equal the reference min.
    d_at_idx = jnp.take_along_axis(full, best_idx, axis=1)
    assert jnp.allclose(d_at_idx, ref_dist, rtol=1e-3, atol=1e-3)
    assert bool(jnp.all((best_idx >= 0) & (best_idx < N)))

    # Also exercise the default (large-tn, auto num_splits) configuration.
    index2 = build_index(index_embeddings)
    bd2, bi2 = retrieve(queries, index2)
    jax.block_until_ready((bd2, bi2))
    assert jnp.allclose(bd2, ref_dist, rtol=1e-3, atol=1e-3)
    d_at_idx2 = jnp.take_along_axis(full, bi2, axis=1)
    assert jnp.allclose(d_at_idx2, ref_dist, rtol=1e-3, atol=1e-3)

    # TODO(synk): pos tagging / frame extraction (AllenPosTagger) and the dict-based
    # add/remove bookkeeping have no tensor equivalent; only the embedding
    # nearest-neighbour retrieval is kernelized.
    print("KERNEL_OK")
</pallas_src>

<mosaic_0001>
module attributes {stable_mosaic.version = 11 : i64} {
  func.func @_retrieve_kernel(%arg0: i32, %arg1: i32, %arg2: memref<8x128xf32, #tpu.memory_space<vmem>>, %arg3: memref<256x128xf32, #tpu.memory_space<vmem>>, %arg4: memref<1x256xf32, #tpu.memory_space<vmem>>, %arg5: memref<1x8x1xf32, #tpu.memory_space<vmem>>, %arg6: memref<1x8x1xi32, #tpu.memory_space<vmem>>, %arg7: memref<8x128xf32, #tpu.memory_space<vmem>>, %arg8: memref<8x128xi32, #tpu.memory_space<vmem>>) attributes {dimension_semantics = [#tpu.dimension_semantics<parallel>, #tpu.dimension_semantics<arbitrary>], iteration_bounds = array<i64: 2, 2>, scalar_prefetch = 0 : i64, scratch_operands = 2 : i64, tpu.core_type = #tpu.core_type<tc>, window_params = [{pipeline_mode = #tpu.pipeline_mode<synchronous>, transform_indices = @transform_0, window_bounds = array<i64: 8, 128>}, {transform_indices = @transform_1, window_bounds = array<i64: 256, 128>}, {transform_indices = @transform_2, window_bounds = array<i64: 1, 256>}, {transform_indices = @transform_3, window_bounds = array<i64: 1, 8, 1>}, {transform_indices = @transform_4, window_bounds = array<i64: 1, 8, 1>}]} {
    %c0_i32 = arith.constant 0 : i32
    %0 = arith.cmpi eq, %arg1, %c0_i32 : i32
    %1 = arith.extui %0 : i1 to i32
    %c0_i32_0 = arith.constant 0 : i32
    %2 = arith.cmpi ne, %1, %c0_i32_0 : i32
    scf.if %2 {
      %cst_17 = arith.constant 0x7F800000 : f32
      %36 = vector.broadcast %cst_17 : f32 to vector<8x128xf32>
      %c0_18 = arith.constant 0 : index
      %c0_19 = arith.constant 0 : index
      %37 = vector.load %arg7[%c0_18, %c0_19] : memref<8x128xf32, #tpu.memory_space<vmem>>, vector<8x128xf32>
      tpu.vector_store %arg7[%c0_18, %c0_19], %36 {strides = array<i32>} : memref<8x128xf32, #tpu.memory_space<vmem>>, vector<8x128xf32>,
      %c0_i32_20 = arith.constant 0 : i32
      %38 = vector.broadcast %c0_i32_20 : i32 to vector<8x128xi32>
      %c0_21 = arith.constant 0 : index
      %c0_22 = arith.constant 0 : index
      %39 = vector.load %arg8[%c0_21, %c0_22] : memref<8x128xi32, #tpu.memory_space<vmem>>, vector<8x128xi32>
      tpu.vector_store %arg8[%c0_21, %c0_22], %38 {strides = array<i32>} : memref<8x128xi32, #tpu.memory_space<vmem>>, vector<8x128xi32>,
    } else {
    }
    %c0 = arith.constant 0 : index
    %c0_1 = arith.constant 0 : index
    %3 = vector.load %arg2[%c0, %c0_1] : memref<8x128xf32, #tpu.memory_space<vmem>>, vector<8x128xf32>
    %c0_2 = arith.constant 0 : index
    %c0_3 = arith.constant 0 : index
    %4 = vector.load %arg3[%c0_2, %c0_3] : memref<256x128xf32, #tpu.memory_space<vmem>>, vector<256x128xf32>
    %cst = arith.constant -2.000000e+00 : f32
    %5 = vector.broadcast %cst : f32 to vector<8x128xf32>
    %6 = arith.mulf %3, %5 : vector<8x128xf32>
    %cst_4 = arith.constant dense<0.000000e+00> : vector<8x256xf32>
    %7 = tpu.matmul %6, %4, %cst_4 {dimension_numbers = #tpu.dot_dimension_numbers<[1], [1], [0], [0], [0, 0, 1, 0], [], []>} : vector<8x128xf32>, vector<256x128xf32>, vector<8x256xf32> -> vector<8x256xf32>
    %c0_5 = arith.constant 0 : index
    %c0_6 = arith.constant 0 : index
    %8 = vector.load %arg4[%c0_5, %c0_6] : memref<1x256xf32, #tpu.memory_space<vmem>>, vector<1x256xf32>
    %9 = vector.broadcast %8 : vector<1x256xf32> to vector<8x256xf32>
    %10 = arith.addf %7, %9 : vector<8x256xf32>
    %c2_i32 = arith.constant 2 : i32
    %11 = arith.muli %arg0, %c2_i32 : i32
    %12 = arith.addi %11, %arg1 : i32
    %c256_i32 = arith.constant 256 : i32
    %13 = arith.muli %12, %c256_i32 : i32
    %14 = tpu.iota {dimensions = array<i32: 1>} : vector<8x128xi32>
    %15 = vector.broadcast %13 : i32 to vector<8x128xi32>
    %16 = arith.addi %15, %14 : vector<8x128xi32>
    %c0_7 = arith.constant 0 : index
    %c0_8 = arith.constant 0 : index
    %17 = vector.load %arg7[%c0_7, %c0_8] : memref<8x128xf32, #tpu.memory_space<vmem>>, vector<8x128xf32>
    %c0_9 = arith.constant 0 : index
    %c0_10 = arith.constant 0 : index
    %18 = vector.load %arg8[%c0_9, %c0_10] : memref<8x128xi32, #tpu.memory_space<vmem>>, vector<8x128xi32>
    %19 = vector.extract_strided_slice %10 {offsets = [0, 0], sizes = [8, 128], strides = [1, 1]} : vector<8x256xf32> to vector<8x128xf32>
    %c0_i32_11 = arith.constant 0 : i32
    %20 = vector.broadcast %c0_i32_11 : i32 to vector<8x128xi32>
    %21 = arith.addi %16, %20 : vector<8x128xi32>
    %22 = arith.cmpf olt, %19, %17 : vector<8x128xf32>
    %23 = arith.select %22, %21, %18 : vector<8x128xi1>, vector<8x128xi32>
    %24 = arith.select %22, %19, %17 : vector<8x128xi1>, vector<8x128xf32>
    %25 = vector.extract_strided_slice %10 {offsets = [0, 128], sizes = [8, 128], strides = [1, 1]} : vector<8x256xf32> to vector<8x128xf32>
    %c128_i32 = arith.constant 128 : i32
    %26 = vector.broadcast %c128_i32 : i32 to vector<8x128xi32>
    %27 = arith.addi %16, %26 : vector<8x128xi32>
    %28 = arith.cmpf olt, %25, %24 : vector<8x128xf32>
    %29 = arith.select %28, %27, %23 : vector<8x128xi1>, vector<8x128xi32>
    %30 = arith.select %28, %25, %24 : vector<8x128xi1>, vector<8x128xf32>
    %c0_12 = arith.constant 0 : index
    %c0_13 = arith.constant 0 : index
    %31 = vector.load %arg7[%c0_12, %c0_13] : memref<8x128xf32, #tpu.memory_space<vmem>>, vector<8x128xf32>
    tpu.vector_store %arg7[%c0_12, %c0_13], %30 {strides = array<i32>} : memref<8x128xf32, #tpu.memory_space<vmem>>, vector<8x128xf32>,
    %c0_14 = arith.constant 0 : index
    %c0_15 = arith.constant 0 : index
    %32 = vector.load %arg8[%c0_14, %c0_15] : memref<8x128xi32, #tpu.memory_space<vmem>>, vector<8x128xi32>
    tpu.vector_store %arg8[%c0_14, %c0_15], %29 {strides = array<i32>} : memref<8x128xi32, #tpu.memory_space<vmem>>, vector<8x128xi32>,
    %c1_i32 = arith.constant 1 : i32
    %33 = arith.cmpi eq, %arg1, %c1_i32 : i32
    %34 = arith.extui %33 : i1 to i32
    %c0_i32_16 = arith.constant 0 : i32
    %35 = arith.cmpi ne, %34, %c0_i32_16 : i32
    scf.if %35 {
      %36 = arith.mulf %3, %3 : vector<8x128xf32>
      %cst_17 = arith.constant dense<0.000000e+00> : vector<8xf32>
      %37 = vector.multi_reduction <add>, %36, %cst_17 [1] : vector<8x128xf32> to vector<8xf32>
      %38 = vector.shape_cast %37 : vector<8xf32> to vector<8x1xf32>
      %cst_18 = arith.constant dense<0x7F800000> : vector<8xf32>
      %39 = vector.multi_reduction <minimumf>, %30, %cst_18 [1] : vector<8x128xf32> to vector<8xf32>
      %40 = vector.shape_cast %39 : vector<8xf32> to vector<8x1xf32>
      %41 = vector.broadcast %40 : vector<8x1xf32> to vector<8x128xf32>
      %42 = arith.cmpf oeq, %30, %41 : vector<8x128xf32>
      %c2147483647_i32 = arith.constant 2147483647 : i32
      %43 = vector.broadcast %c2147483647_i32 : i32 to vector<8x128xi32>
      %44 = arith.select %42, %29, %43 : vector<8x128xi1>, vector<8x128xi32>
      %cst_19 = arith.constant dense<2147483647> : vector<8xi32>
      %45 = vector.multi_reduction <minsi>, %44, %cst_19 [1] : vector<8x128xi32> to vector<8xi32>
      %46 = vector.shape_cast %45 : vector<8xi32> to vector<8x1xi32>
      %47 = arith.addf %40, %38 : vector<8x1xf32>
      %cst_20 = arith.constant 0.000000e+00 : f32
      %48 = vector.broadcast %cst_20 : f32 to vector<8x1xf32>
      %49 = arith.maximumf %47, %48 : vector<8x1xf32>
      %c0_21 = arith.constant 0 : index
      %c0_22 = arith.constant 0 : index
      %c0_23 = arith.constant 0 : index
      %50 = vector.load %arg5[%c0_21, %c0_22, %c0_23] : memref<1x8x1xf32, #tpu.memory_space<vmem>>, vector<1x8x1xf32>
      %51 = vector.shape_cast %50 : vector<1x8x1xf32> to vector<8x1xf32>
      %52 = vector.shape_cast %49 : vector<8x1xf32> to vector<1x8x1xf32>
      tpu.vector_store %arg5[%c0_21, %c0_22, %c0_23], %52 {strides = array<i32>} : memref<1x8x1xf32, #tpu.memory_space<vmem>>, vector<1x8x1xf32>,
      %c0_24 = arith.constant 0 : index
      %c0_25 = arith.constant 0 : index
      %c0_26 = arith.constant 0 : index
      %53 = vector.load %arg6[%c0_24, %c0_25, %c0_26] : memref<1x8x1xi32, #tpu.memory_space<vmem>>, vector<1x8x1xi32>
      %54 = vector.shape_cast %53 : vector<1x8x1xi32> to vector<8x1xi32>
      %55 = vector.shape_cast %46 : vector<8x1xi32> to vector<1x8x1xi32>
      tpu.vector_store %arg6[%c0_24, %c0_25, %c0_26], %55 {strides = array<i32>} : memref<1x8x1xi32, #tpu.memory_space<vmem>>, vector<1x8x1xi32>,
    } else {
    }
    return
  }
  func.func @transform_0(%arg0: i32, %arg1: i32) -> (i32, i32) {
    %c0_i32 = arith.constant 0 : i32
    %c0_i32_0 = arith.constant 0 : i32
    %c0_i32_1 = arith.constant 0 : i32
    return %c0_i32, %c0_i32_0 : i32, i32
  }
  func.func @transform_1(%arg0: i32, %arg1: i32) -> (i32, i32) {
    %c2_i32 = arith.constant 2 : i32
    %0 = arith.muli %arg0, %c2_i32 : i32
    %1 = arith.addi %0, %arg1 : i32
    %c0_i32 = arith.constant 0 : i32
    %c0_i32_0 = arith.constant 0 : i32
    return %1, %c0_i32 : i32, i32
  }
  func.func @transform_2(%arg0: i32, %arg1: i32) -> (i32, i32) {
    %c2_i32 = arith.constant 2 : i32
    %0 = arith.muli %arg0, %c2_i32 : i32
    %1 = arith.addi %0, %arg1 : i32
    %c0_i32 = arith.constant 0 : i32
    %c0_i32_0 = arith.constant 0 : i32
    return %c0_i32, %1 : i32, i32
  }
  func.func @transform_3(%arg0: i32, %arg1: i32) -> (i32, i32, i32) {
    %c0_i32 = arith.constant 0 : i32
    %c0_i32_0 = arith.constant 0 : i32
    %c0_i32_1 = arith.constant 0 : i32
    return %arg0, %c0_i32, %c0_i32_0 : i32, i32, i32
  }
  func.func @transform_4(%arg0: i32, %arg1: i32) -> (i32, i32, i32) {
    %c0_i32 = arith.constant 0 : i32
    %c0_i32_0 = arith.constant 0 : i32
    %c0_i32_1 = arith.constant 0 : i32
    return %arg0, %c0_i32, %c0_i32_0 : i32, i32, i32
  }
}

</mosaic_0001>

<bundles_post_ra>
// kernel: _retrieve_jit.1
= control target key start
LH: loop header
LB: loop body
LE: loop exit
PB: predicated region body
PF: predicated region fallthrough
CT: control target
= control target key end

     0   :  { %s1111_s0 = inlined_call_operand.hbm [shape: f32[8,128], index: 0, kind: input, shape index: {}]   ;;  %s1112_s1 = inlined_call_operand.hbm [shape: f32[1024,128], index: 1, kind: input, shape index: {}]   ;;  %s1113_s2 = inlined_call_operand.hbm [shape: f32[1,1024], index: 2, kind: input, shape index: {}]   ;;  %s1114_s3 = inlined_call_operand.vmem [shape: f32[2,8,1], index: 3, kind: output, shape index: {0}]   ;;  %s1115_s4 = inlined_call_operand.vmem [shape: s32[2,8,1], index: 4, kind: output, shape index: {1}]  }
   0x1   :  { %1118 = sst [smem:[#allocation13_spill]] %s1112_s1 }
   0x2   :  { %10 = vsyncpa [#allocation5], 0 }
   0x3   :  { %11 = vsyncpa [#allocation7], 0 }
   0x4   :  { %13 = vsyncpa [#allocation7 + $0x1], 0  ;;  %s899_s15 = smov 0   ;;  %s901_s16 = smov 0  }
   0x5   :  { %s903_s17 = smov 0   ;;  %s905_s18 = smov 0  }
   0x6   :  { %s907_s19 = smov 0   ;;  %s909_s20 = smov 0  }
   0x7   :  { %s911_s21 = smov 0   ;;  %s913_s22 = smov 0  }
   0x8 LB: > { %s28_s23 = sadd.s32 1, %s859_s20  ;;  %s31_s24 = sadd.s32 1, %s863_s21  ;;  %s867_s22 = sphi %s913_s22, %s19_s22   ;;  %s863_s21 = sphi %s911_s21, %s1135_s21   ;;  %s859_s20 = sphi %s909_s20, %s1134_s20   ;;  %s855_s19 = sphi %s907_s19, %s1133_s19   ;;  %s851_s18 = sphi %s905_s18, %s1132_s18   ;;  %s847_s17 = sphi %s903_s17, %s1131_s17   ;;  %s843_s16 = sphi %s901_s16, %s1130_s16   ;;  %s839_s15 = sphi %s899_s15, %s1129_s15  }
   0x9   : > { %p29_p0 = scmp.ge.s32.totalorder %s28_s23, 2  ;;  %s589_s25 = sshll.u32 %s863_s21, 1 }
   0xa   : > { %s943_s26 = sadd.s32 %s859_s20, %s589_s25  ;;  %s63_s27 = sadd.s32 1, %s847_s17 }
   0xb   : > { %s1137_s23 = smov (%p29_p0, %s28_s23), 0  ;;  %s1139_s24 = smov (!%p29_p0, %s31_s24), %s863_s21 }
   0xc   : > { %1119 = sst [smem:[#allocation11_spill]] %s1137_s23  ;;  %p70_p1 = scmp.ne.s32.totalorder %s847_s17, %s843_s16 }
   0xd   : > { %p71_p2 = scmp.eq.s32.totalorder %s867_s22, 0  ;;  %p33_p3 = scmp.ge.s32.totalorder %s1139_s24, 2 }
   0xe   : > { %p636_p5 = scmp.lt.s32.totalorder %s867_s22, 4  ;;  %s194_s29 = sand.u32 1, %s867_s22  }
   0xf   : > { %p952_p4 = por %p71_p2, %p70_p1  ;;  %s1141_s24 = smov (%p33_p3, %s1139_s24), 0 }
  0x10   : > { %1121 = sst [smem:[#allocation12_spill]] %s1141_s24  ;;  %s196_s30 = sand.u32 1, %s847_s17  }
  0x11   : > { %s590_s5 = sshll.u32 %s1141_s24, 1  ;;  %s596_s7 = sshll.u32 %s196_s30, 8 }
  0x12   : > { %s59_s6 = sadd.s32 %s590_s5, %s1137_s23  ;;  %s615_s9 = sshll.u32 %s943_s26, 8 }
  0x13   : > { %s60_s8 = ssub.s32 %s943_s26, %s59_s6  ;;  %s1122_s1 = sld [smem:[#allocation13_spill]] }
  0x14   : > { %p61_p6 = scmp.eq.s32.totalorder %s60_s8, 0  ;;  %s198_s13 = scalar_lea.vmem [#allocation6], %s596_s7 }
  0x15   : > { %s208_s14 = sshll.u32 %s198_s13, 4  ;;  %p977_p7 = pnand %p636_p5, %p952_p4  ;;  %s209_s14 = int_to_ptr.vmem [resolvable:$true] %s208_s14 }
  0x16   : > { %s971_s25 = scalar_select %p61_p6, %s847_s17, %s63_s27  }
  0x17   : > { %s195_s6 = scalar_lea.sflag [#allocation7], %s194_s29  ;;  %s869_s8 = smov 128  }
  0x18   : > { %s870_s10 = smov 8   ;;  %s587_s7 = sadd.s32 4294967295, %s867_s22  }
  0x19   : > { %s205_s12 = scalar_lea.hbm %s1122_s1, %s615_s9  ;;  %p76_p8 = scmp.ne.s32.totalorder %s843_s16, %s839_s15 }
  0x1a   : > { %s206_s24 = sshll.u32 %s205_s12, 4  ;;  %p986_p9 = scmp.eq.s32.totalorder %s587_s7, 0  ;;  %s207_s24 = int_to_ptr.hbm [resolvable:$true] %s206_s24 }
  0x1b   : > { %631 = dma.hbm_to_vmem [thread:$0]  (!%p977_p7), %s207_s24, 4096, %s209_s14, %s195_s6, %s869_s8, %s869_s8, %s870_s10  }
  0x1c   : > { %p593_p10 = scmp.ge.s32.totalorder %s867_s22, 1  ;;  %p169_p11 = scmp.lt.s32.totalorder %s867_s22, 5 }
  0x1d   : > { %p994_p12 = por %p986_p9, %p76_p8  ;;  %s181_s15 = sshll.u32 %s1111_s0, 4  ;;  %s182_s15 = int_to_ptr.hbm [resolvable:$true] %s181_s15 }
  0x1e   : > { %p998_p13 = pnand %p593_p10, %p169_p11  ;;  %s871_s11 = smov [#allocation4]  }
  0x1f   : > { %s183_s12 = sshll.u32 %s871_s11, 4  ;;  %s600_s13 = sshll.u32 %s196_s30, 1  ;;  %s184_s12 = int_to_ptr.vmem [resolvable:$true] %s183_s12 }
  0x20   : > { %p624_p0 = pneg %p998_p13  ;;  %s602_s14 = sshll.u32 %s943_s26, 1 }
  0x21   : > { %s222_s8 = scalar_lea.vmem [#allocation8], %s600_s13  ;;  %s228_s24 = scalar_lea.hbm %s1113_s2, %s602_s14 }
  0x22   : > { %p625_p1 = pnand %p624_p0, %p986_p9  ;;  %s232_s10 = sshll.u32 %s222_s8, 4  ;;  %s233_s10 = int_to_ptr.vmem [resolvable:$true] %s232_s10 }
  0x23   : > { %s230_s9 = sshll.u32 %s228_s24, 4  ;;  %241 = sbr.rel (%p998_p13) target bundleno = 615 (0x267), region = 32  ;;  %s231_s9 = int_to_ptr.hbm [resolvable:$true] %s230_s9 }
  0x24   : > { %627 = dma.hbm_to_vmem [thread:$0]  (!%p625_p1), %s182_s15, 128, %s184_s12, [#allocation5]  }
  0x25   : > { %634 = dma.hbm_to_vmem [thread:$0]  (!%p977_p7), %s231_s9, 32, %s233_s10, %s195_s6  }
  0x28   : > { %830 = dma.done.wait (%p986_p9), [#allocation5], 128  }
  0x29   : > { %832 = vsyncadd (%p986_p9), [#allocation5], 4294967168  ;;  %s248_s26 = sand.u32 1, %s587_s7   ;;  %s250_s1 = sand.u32 1, %s843_s16  }
  0x2a   : > { %s605_s23 = sshll.u32 %s250_s1, 8  ;;  %s249_s30 = scalar_lea.sflag [#allocation7], %s248_s26 }
  0x2b   : > { %s1024_s15 = scalar_lea.vmem [#allocation6], %s605_s23 }
  0x2c   : > { %834 = dma.done.wait (%p994_p12), %s249_s30, 4128  }
  0x2d   : > { %836 = vsyncadd (%p994_p12), %s249_s30, 4294963168  ;;  %s1030_s5 = sshll.u32 %s250_s1, 1  ;;  %p302_p2 = scmp.lt.s32.totalorder %s855_s19, 1 }
  0x2e   : > { %s262_s28 = scalar_lea.vmem [#allocation8], %s1030_s5  ;;  %p609_p3 = scmp.ne.s32.totalorder %s851_s18, 0 }
  0x2f   : > { %s303_s6 = scalar_select %p302_p2, %s855_s19, 1 }
  0x30   : > { %313 = sbr.rel (%p609_p3) target bundleno = 56 (0x38), region = 48 }
  0x31   : > { %s607_s27 = sshll.u32 %s303_s6, 3 }
  0x32   : > { %s1037_s11 = scalar_lea.vmem %s1114_s3, %s607_s27  ;;  %s1042_s14 = scalar_lea.vmem %s1115_s4, %s607_s27 }
  0x35   : > { %v872_v0 = vmov inf   ;;  %v873_v1 = vmov 0  }
  0x36   : > { %314 = vst [vmem:[#allocation2] sm:$0xff] %v872_v0 }
  0x37   : > { %315 = vst [vmem:[#allocation3] sm:$0xff] %v873_v1 }
  0x38 PF: > { %v332_v2 = vld [vmem:[%s1024_s15 + $0x78] sm:$0xff]  ;;  %v331_v4 = vld [vmem:[%s1024_s15 + $0x70] sm:$0xff]  ;;  %v330_v6 = vld [vmem:[%s1024_s15 + $0x68] sm:$0xff]  ;;  %s610_s8 = sshll.u32 %s855_s19, 1  ;;  %v399_v36 = vlaneseq  ;;  %p612_p4 = scmp.ne.s32.totalorder %s851_s18, 1 }
  0x39   : > { %v348_v3 = vld [vmem:[%s1024_s15 + $0xf8] sm:$0xff]  ;;  %356 = vmatpush.xpose.msra.mxu0 %v332_v2  ;;  %v347_v5 = vld [vmem:[%s1024_s15 + $0xf0] sm:$0xff]  ;;  %v346_v7 = vld [vmem:[%s1024_s15 + $0xe8] sm:$0xff]  ;;  %s397_s10 = sadd.s32 %s851_s18, %s610_s8 }
  0x3a   : > { %376 = vmatpush.xpose.msra.mxu1 %v348_v3  ;;  %v329_v8 = vld [vmem:[%s1024_s15 + $0x60] sm:$0xff]  ;;  %v328_v10 = vld [vmem:[%s1024_s15 + $0x58] sm:$0xff]  ;;  %v327_v12 = vld [vmem:[%s1024_s15 + $0x50] sm:$0xff]  ;;  %s611_s24 = sshll.u32 %s397_s10, 8  ;;  %v400_v38 = vand.u32 127, %v399_v36 }
  0x3b   : > { %v345_v9 = vld [vmem:[%s1024_s15 + $0xe0] sm:$0xff]  ;;  %v344_v11 = vld [vmem:[%s1024_s15 + $0xd8] sm:$0xff]  ;;  %v343_v13 = vld [vmem:[%s1024_s15 + $0xd0] sm:$0xff]  ;;  %v401_v39 = vstv %s611_s24 }
  0x3c   : > { %v326_v14 = vld [vmem:[%s1024_s15 + $0x48] sm:$0xff]  ;;  %v325_v16 = vld [vmem:[%s1024_s15 + $0x40] sm:$0xff]  ;;  %v324_v18 = vld [vmem:[%s1024_s15 + $0x38] sm:$0xff]  ;;  %v402_v42 = vadd.s32 %v401_v39, %v400_v38 }
  0x3d   : > { %357 = vmatpush.xpose.msra.mxu0 %v331_v4  ;;  %v342_v15 = vld [vmem:[%s1024_s15 + $0xc8] sm:$0xff]  ;;  %v341_v17 = vld [vmem:[%s1024_s15 + $0xc0] sm:$0xff]  ;;  %v340_v19 = vld [vmem:[%s1024_s15 + $0xb8] sm:$0xff] }
  0x3e   : > { %377 = vmatpush.xpose.msra.mxu1 %v347_v5  ;;  %v323_v20 = vld [vmem:[%s1024_s15 + $0x30] sm:$0xff]  ;;  %v322_v22 = vld [vmem:[%s1024_s15 + $0x28] sm:$0xff]  ;;  %v321_v24 = vld [vmem:[%s1024_s15 + $0x20] sm:$0xff]  ;;  %v408_v49 = vadd.s32 128, %v402_v42 }
  0x3f   : > { %v339_v21 = vld [vmem:[%s1024_s15 + $0xb0] sm:$0xff]  ;;  %v338_v23 = vld [vmem:[%s1024_s15 + $0xa8] sm:$0xff]  ;;  %v337_v25 = vld [vmem:[%s1024_s15 + $0xa0] sm:$0xff] }
  0x40   : > { %v320_v26 = vld [vmem:[%s1024_s15 + $0x18] sm:$0xff]  ;;  %v319_v28 = vld [vmem:[%s1024_s15 + $0x10] sm:$0xff]  ;;  %v318_v30 = vld [vmem:[%s1024_s15 + $0x8] sm:$0xff] }
  0x41   : > { %358 = vmatpush.xpose.msra.mxu0 %v330_v6  ;;  %v336_v27 = vld [vmem:[%s1024_s15 + $0x98] sm:$0xff]  ;;  %v335_v29 = vld [vmem:[%s1024_s15 + $0x90] sm:$0xff]  ;;  %v334_v31 = vld [vmem:[%s1024_s15 + $0x88] sm:$0xff] }
  0x42   : > { %378 = vmatpush.xpose.msra.mxu1 %v346_v7  ;;  %v316_v32 = vld [vmem:[#allocation4] sm:$0xff]  ;;  %v317_v33 = vld [vmem:[%s1024_s15] sm:$0xff]  ;;  %v403_v44 = vld [vmem:[#allocation2] sm:$0xff] }
  0x43   : > { %v333_v34 = vld [vmem:[%s1024_s15 + $0x80] sm:$0xff]  ;;  %v349_v35 = vmul.f32 -2.0, %v316_v32  ;;  %v404_v47 = vld [vmem:[#allocation3] sm:$0xff] }
  0x44   : > { %v350_v37 = vld [vmem:[%s262_s28] sm:$0x3] }
  0x45   : > { %359 = vmatpush.xpose.msra.mxu0 %v329_v8  ;;  %v352_v40 = vperm.slane %v350_v37, 0  ;;  %v353_v41 = vperm.slane %v350_v37, 1 }
  0x46   : > { %379 = vmatpush.xpose.msra.mxu1 %v345_v9 }
  0x49   : > { %360 = vmatpush.xpose.msra.mxu0 %v328_v10 }
  0x4a   : > { %380 = vmatpush.xpose.msra.mxu1 %v344_v11 }
  0x4d   : > { %361 = vmatpush.xpose.msra.mxu0 %v327_v12 }
  0x4e   : > { %381 = vmatpush.xpose.msra.mxu1 %v343_v13 }
  0x51   : > { %362 = vmatpush.xpose.msra.mxu0 %v326_v14 }
  0x52   : > { %382 = vmatpush.xpose.msra.mxu1 %v342_v15 }
  0x55   : > { %363 = vmatpush.xpose.msra.mxu0 %v325_v16 }
  0x56   : > { %383 = vmatpush.xpose.msra.mxu1 %v341_v17 }
  0x59   : > { %364 = vmatpush.xpose.msra.mxu0 %v324_v18 }
  0x5a   : > { %384 = vmatpush.xpose.msra.mxu1 %v340_v19 }
  0x5d   : > { %365 = vmatpush.xpose.msra.mxu0 %v323_v20 }
  0x5e   : > { %385 = vmatpush.xpose.msra.mxu1 %v339_v21 }
  0x61   : > { %366 = vmatpush.xpose.msra.mxu0 %v322_v22 }
  0x62   : > { %386 = vmatpush.xpose.msra.mxu1 %v338_v23 }
  0x65   : > { %367 = vmatpush.xpose.msra.mxu0 %v321_v24 }
  0x66   : > { %387 = vmatpush.xpose.msra.mxu1 %v337_v25 }
  0x69   : > { %368 = vmatpush.xpose.msra.mxu0 %v320_v26 }
  0x6a   : > { %388 = vmatpush.xpose.msra.mxu1 %v336_v27 }
  0x6d   : > { %369 = vmatpush.xpose.msra.mxu0 %v319_v28 }
  0x6e   : > { %389 = vmatpush.xpose.msra.mxu1 %v335_v29 }
  0x71   : > { %370 = vmatpush.xpose.msra.mxu0 %v318_v30 }
  0x72   : > { %390 = vmatpush.xpose.msra.mxu1 %v334_v31 }
  0x75   : > { %371 = vmatpush.xpose.msra.mxu0 %v317_v33 }
  0x76   : > { %391 = vmatpush.xpose.msra.mxu1 %v333_v34 }
  0x78   : > { %372 = vmatmul.f32.vlgmr.msra.gmra.mxu0 %v349_v35 }
  0x79   : > { %392 = vmatmul.f32.vlgmr.msra.gmra.mxu1 %v349_v35 }
  0xf5   : > { %v373_v43 = vpop.f32.mrf.mxu0 }
  0xf6   : > { %v393_v45 = vpop.f32.mrf.mxu1  ;;  %v374_v46 = vadd.f32 %v373_v43, %v352_v40 }
  0xf7   : > { %v394_v48 = vadd.f32 %v393_v45, %v353_v41 }
  0xf8   : > { %vm405_vm0 = vcmp.lt.f32.partialorder %v374_v46, %v403_v44 }
  0xf9   : > { %v406_v50 = vsel %vm405_vm0, %v402_v42, %v404_v47  ;;  %v407_v51 = vsel %vm405_vm0, %v374_v46, %v403_v44  ;;  %417 = sbr.rel (%p612_p4) target bundleno = 615 (0x267), region = 52 }
  0xfa   : > { %vm409_vm1 = vcmp.lt.f32.partialorder %v394_v48, %v407_v51 }
  0xfb   : > { %v410_v52 = vsel %vm409_vm1, %v408_v49, %v406_v50  ;;  %v411_v53 = vsel %vm409_vm1, %v394_v48, %v407_v51 }
  0xfc   : > { %412 = vst [vmem:[#allocation2] sm:$0xff] %v411_v53 }
  0xfd   : > { %413 = vst [vmem:[#allocation3] sm:$0xff] %v410_v52 }
  0xfe   : > { %421 = vmin.xlane.f32.xlu0 %v411_v53  ;;  %v418_v54 = vmul.f32 %v316_v32, %v316_v32  ;;  %vm441_vm3 = vcmask 7168  }
 0x100   : > { %419 = vadd.xlane.f32.xlu1 %v418_v54 }
 0x171   : > { %v422_v55 = vpop.xlane.xlu0 %421 }
 0x172   : > { %vm423_vm2 = vcmp.eq.f32.partialorder %v411_v53, %v422_v55 }
 0x173   : > { %v424_v56 = vsel %vm423_vm2, %v410_v52, 2147483647  ;;  %v420_v57 = vpop.xlane.xlu1 %419 }
 0x174   : > { %v439_v58 = vadd.f32 %v422_v55, %v420_v57  ;;  %v426_v59 = vshra.s32 %v424_v56, 16  ;;  %v425_v62 = vand.u32 65535, %v424_v56 }
 0x176   : > { %v440_v60 = vmax.f32 %v439_v58, 0.0  ;;  %v428_v61 = vcvt.s32.f32 %v426_v59  ;;  %v427_v0 = vcvt.s32.f32 %v425_v62 }
 0x178   : > { %442 = vst.msk [vmem:[%s1037_s11] sm:$0xff] %vm441_vm3, %v440_v60  ;;  %429 = vmin.xlane.f32.xlu0 %v428_v61 }
 0x1eb   : > { %v430_v63 = vpop.xlane.xlu0 %429 }
 0x1ec   : > { %vm431_vm4 = vcmp.eq.f32.partialorder %v428_v61, %v430_v63  ;;  %v436_v2 = vcvt.f32.s32 %v430_v63 }
 0x1ed   : > { %v432_v1 = vsel %vm431_vm4, %v427_v0, inf }
 0x1ee   : > { %433 = vmin.xlane.f32.xlu1 %v432_v1  ;;  %v437_v4 = vshll.u32 %v436_v2, 16 }
 0x261   : > { %v434_v3 = vpop.xlane.xlu1 %433 }
 0x262   : > { %v435_v5 = vcvt.f32.s32 %v434_v3 }
 0x264   : > { %v438_v6 = vadd.s32 %v437_v4, %v435_v5 }
 0x266   : > { %443 = vst.msk [vmem:[%s1042_s14] sm:$0xff] %vm441_vm3, %v438_v6 }
 0x267 PF: > { %s19_s22 = sadd.s32 1, %s867_s22   ;;  %s1127_s9 = sld [smem:[#allocation11_spill]] }
 0x268   : > { %p16_p5 = scmp.ge.s32.totalorder %s19_s22, 6   ;;  %s1128_s26 = sld [smem:[#allocation12_spill]] }
 0x269   : > { %s1129_s15 = smov %s843_s16  ;;  %s1130_s16 = smov %s847_s17 }
 0x26a   : > { %s1131_s17 = smov %s971_s25  ;;  %s1132_s18 = smov %s859_s20 }
 0x26b   : > { %s1133_s19 = smov %s863_s21  ;;  %18 = sbr.rel (!%p16_p5) target bundleno = 8 (0x8), region = 108 }
 0x26d   : > { %s1134_s20 = smov %s1127_s9 }
 0x26e   : > { %s1135_s21 = smov %s1128_s26 }
 0x270   :  { %477 = vsyncpa [#allocation5], 1 }
 0x271   :  { %479 = vsyncpa [#allocation5 + $0x1], 1 }
 0x272   :  { %480 = vsyncpa [#allocation7], 1 }
 0x273   :  { %482 = vsyncpa [#allocation7 + $0x1], 1 }

</bundles_post_ra>
